<compile_context>
chip_gen: v7x
topology: tpu7x:2x2x1
jax: 0.10.0
libtpu: 0.0.40
codegen_flags: <defaults>
</compile_context>

<pallas_src>
import jax
import jax.numpy as jnp
from jax.experimental import pallas as pl
from jax.experimental.pallas import tpu as pltpu

LANE = 128
CHUNK_ROWS = 256        # 256*128*4 B = 128 KiB of f32 intermediates per chunk
MAX_BLOCK_ROWS = 4096   # 2 MiB per f32 input block (x2 inputs x2 buffers = 8 MiB)
SPLIT_ROWS = 1024       # force >=2 grid steps (v7x megacore) above 2*this many rows


def _round_up(x, m):
    return -(-x // m) * m


def _interval_terms(p, l):
    """Elementwise interval penalty + squared error (pure jnp; used only for
    the < 128-element lane tail)."""
    is_one = l == 1.0
    is_zero = l == 0.0
    m1 = is_one & (p > -0.2) & (p < 0.2)
    mz = is_zero & (p > 0.8) & (p < 1.2)
    vz = jnp.where(p < 1.0, 0.2 * p + 0.8, 1.2 - p)
    contrib = jnp.where(m1, 0.2 - p, jnp.where(mz, vz, 0.0))
    diff = p - l
    return contrib, diff * diff


def _make_kernel(block_rows, chunk_rows, valid_rows, inv_n, needs_mask):
    num_chunks = block_rows // chunk_rows
    groups = chunk_rows // 8
    unroll = num_chunks if num_chunks <= 8 else 8

    def kernel(pred_ref, label_ref, out_ref):
        blk_row0 = pl.program_id(0) * block_rows

        def chunk_body(c, carry):
            acc_i, acc_sq = carry
            r0 = pl.multiple_of(c * chunk_rows, chunk_rows)
            p = pred_ref[pl.ds(r0, chunk_rows), :].astype(jnp.float32)
            l = label_ref[pl.ds(r0, chunk_rows), :].astype(jnp.float32)

            is_one = l == 1.0
            is_zero = l == 0.0
            # label==1 cases collapse to: -0.2 < p < 0.2  ->  0.2 - p
            m1 = is_one & (p > -0.2) & (p < 0.2)
            # label==0 cases collapse to: 0.8 < p < 1.2, value split at p == 1
            mz = is_zero & (p > 0.8) & (p < 1.2)
            vz = jnp.where(p < 1.0, 0.2 * p + 0.8, 1.2 - p)
            contrib = jnp.where(m1, 0.2 - p, jnp.where(mz, vz, 0.0))
            diff = p - l
            sq = diff * diff

            if needs_mask:
                # ragged last block: zero contributions from rows past the end
                row = jax.lax.broadcasted_iota(jnp.int32, (chunk_rows, LANE), 0)
                ok = (blk_row0 + r0 + row) < valid_rows
                contrib = jnp.where(ok, contrib, 0.0)
                sq = jnp.where(ok, sq, 0.0)

            # fold sublane groups of 8 with plain VALU adds (tile-aligned; no
            # XLU reduce, no masked stores)
            acc_i = acc_i + contrib.reshape(groups, 8, LANE).sum(axis=0)
            acc_sq = acc_sq + sq.reshape(groups, 8, LANE).sum(axis=0)
            return acc_i, acc_sq

        zero = jnp.zeros((8, LANE), jnp.float32)
        acc_i, acc_sq = jax.lax.fori_loop(
            0, num_chunks, chunk_body, (zero, zero), unroll=unroll)
        # combine the two partials on the already-reduced (8,128) vreg:
        # halves output streams and the wrapper-side reduce for ~2 VALU ops.
        out_ref[...] = acc_i + jnp.float32(inv_n) * acc_sq

    return kernel


def interval_loss(pred, label):
    """Equivalent of IntervalLoss(torch.nn.MSELoss)(pred, label) -> scalar."""
    n = pred.size
    inv_n = 1.0 / float(n)
    pf = pred.reshape(-1)
    lf = label.reshape(-1)

    n_main = (n // LANE) * LANE
    total = jnp.float32(0.0)

    if n_main > 0:
        rows = n_main // LANE
        rows8 = _round_up(rows, 8)

        if rows8 <= CHUNK_ROWS:
            block_rows = rows8
            chunk_rows = rows8
        else:
            chunk_rows = CHUNK_ROWS
            # aim for >= 2 grid steps when there is enough work (v7x: 2 TCs)
            target = -(-rows8 // 2) if rows8 >= 2 * SPLIT_ROWS else rows8
            block_rows = min(MAX_BLOCK_ROWS, _round_up(target, CHUNK_ROWS))

        grid_size = -(-rows // block_rows)
        needs_mask = (rows % block_rows) != 0

        p2 = pf[:n_main].reshape(rows, LANE)   # free reshape, no pad copy
        l2 = lf[:n_main].reshape(rows, LANE)

        kernel = _make_kernel(block_rows, chunk_rows, rows, inv_n, needs_mask)
        partials = pl.pallas_call(
            kernel,
            out_shape=jax.ShapeDtypeStruct((grid_size * 8, LANE), jnp.float32),
            grid_spec=pltpu.PrefetchScalarGridSpec(
                num_scalar_prefetch=0,
                grid=(grid_size,),
                in_specs=[pl.BlockSpec((block_rows, LANE), lambda i: (i, 0)),
                          pl.BlockSpec((block_rows, LANE), lambda i: (i, 0))],
                out_specs=pl.BlockSpec((8, LANE), lambda i: (i, 0)),
            ),
            compiler_params=pltpu.CompilerParams(
                dimension_semantics=("parallel",)),
        )(p2, l2)
        total = total + jnp.sum(partials)

    if n_main < n:
        # < 128-element lane tail: reduced in the wrapper (negligible work);
        # avoids a full host-side pad copy of both inputs.
        pt = pf[n_main:].astype(jnp.float32)
        lt = lf[n_main:].astype(jnp.float32)
        ci, sq = _interval_terms(pt, lt)
        total = total + jnp.sum(ci) + jnp.sum(sq) * jnp.float32(inv_n)

    return total


def _reference(pred, label):
    p = pred.astype(jnp.float32)
    l = label.astype(jnp.float32)
    loss = jnp.zeros_like(p)
    m1 = (l == 1.0) & (p > -0.2) & (p < 0.2)
    loss = jnp.where(m1, 0.2 - p, loss)
    m3 = (l == 0.0) & (p > 0.8) & (p < 1.0)
    loss = jnp.where(m3, 0.2 * (p - 1.0) + 1.0, loss)
    m4 = (l == 0.0) & (p >= 1.0) & (p < 1.2)
    loss = jnp.where(m4, 0.2 - (p - 1.0), loss)
    return jnp.sum(loss) + jnp.mean((p - l) ** 2)


if __name__ == "__main__":
    key = jax.random.PRNGKey(0)
    k1, k2 = jax.random.split(key)
    shape = (2, 4, 16, 16)  # NCHW
    pred = jax.random.uniform(k1, shape, dtype=jnp.float32,
                              minval=-0.3, maxval=1.3)
    label = jax.random.bernoulli(k2, 0.5, shape).astype(jnp.float32)

    out = jax.block_until_ready(interval_loss(pred, label))
    ref = jax.block_until_ready(_reference(pred, label))

    assert jnp.allclose(out, ref, rtol=1e-5, atol=1e-5), (out, ref)
    print("KERNEL_OK")
</pallas_src>

<mosaic_0001>
module attributes {stable_mosaic.version = 11 : i64} {
  func.func @kernel(%arg0: i32, %arg1: memref<16x128xf32, #tpu.memory_space<vmem>>, %arg2: memref<16x128xf32, #tpu.memory_space<vmem>>, %arg3: memref<8x128xf32, #tpu.memory_space<vmem>>) attributes {dimension_semantics = [#tpu.dimension_semantics<parallel>], iteration_bounds = array<i64: 1>, scalar_prefetch = 0 : i64, scratch_operands = 0 : i64, tpu.core_type = #tpu.core_type<tc>, window_params = [{transform_indices = @transform_0, window_bounds = array<i64: 16, 128>}, {transform_indices = @transform_1, window_bounds = array<i64: 16, 128>}, {transform_indices = @transform_2, window_bounds = array<i64: 8, 128>}]} {
    %cst = arith.constant 0.000000e+00 : f32
    %0 = vector.broadcast %cst : f32 to vector<8x128xf32>
    %c0_i32 = arith.constant 0 : i32
    %c16_i32 = arith.constant 16 : i32
    %1 = arith.muli %c0_i32, %c16_i32 : i32
    %2 = tpu.assume_multiple %1, 16 : i32
    %3 = arith.index_cast %2 : i32 to index
    %c0 = arith.constant 0 : index
    %4 = vector.load %arg1[%3, %c0] : memref<16x128xf32, #tpu.memory_space<vmem>>, vector<16x128xf32>
    %5 = arith.index_cast %2 : i32 to index
    %c0_0 = arith.constant 0 : index
    %6 = vector.load %arg2[%5, %c0_0] : memref<16x128xf32, #tpu.memory_space<vmem>>, vector<16x128xf32>
    %cst_1 = arith.constant 1.000000e+00 : f32
    %7 = vector.broadcast %cst_1 : f32 to vector<16x128xf32>
    %8 = arith.cmpf oeq, %6, %7 : vector<16x128xf32>
    %cst_2 = arith.constant 0.000000e+00 : f32
    %9 = vector.broadcast %cst_2 : f32 to vector<16x128xf32>
    %10 = arith.cmpf oeq, %6, %9 : vector<16x128xf32>
    %cst_3 = arith.constant -2.000000e-01 : f32
    %11 = vector.broadcast %cst_3 : f32 to vector<16x128xf32>
    %12 = arith.cmpf ogt, %4, %11 : vector<16x128xf32>
    %13 = arith.andi %8, %12 : vector<16x128xi1>
    %cst_4 = arith.constant 2.000000e-01 : f32
    %14 = vector.broadcast %cst_4 : f32 to vector<16x128xf32>
    %15 = arith.cmpf olt, %4, %14 : vector<16x128xf32>
    %16 = arith.andi %13, %15 : vector<16x128xi1>
    %cst_5 = arith.constant 8.000000e-01 : f32
    %17 = vector.broadcast %cst_5 : f32 to vector<16x128xf32>
    %18 = arith.cmpf ogt, %4, %17 : vector<16x128xf32>
    %19 = arith.andi %10, %18 : vector<16x128xi1>
    %cst_6 = arith.constant 1.200000e+00 : f32
    %20 = vector.broadcast %cst_6 : f32 to vector<16x128xf32>
    %21 = arith.cmpf olt, %4, %20 : vector<16x128xf32>
    %22 = arith.andi %19, %21 : vector<16x128xi1>
    %cst_7 = arith.constant 1.000000e+00 : f32
    %23 = vector.broadcast %cst_7 : f32 to vector<16x128xf32>
    %24 = arith.cmpf olt, %4, %23 : vector<16x128xf32>
    %cst_8 = arith.constant 2.000000e-01 : f32
    %25 = vector.broadcast %cst_8 : f32 to vector<16x128xf32>
    %26 = arith.mulf %25, %4 : vector<16x128xf32>
    %cst_9 = arith.constant 8.000000e-01 : f32
    %27 = vector.broadcast %cst_9 : f32 to vector<16x128xf32>
    %28 = arith.addf %26, %27 : vector<16x128xf32>
    %cst_10 = arith.constant 1.200000e+00 : f32
    %29 = vector.broadcast %cst_10 : f32 to vector<16x128xf32>
    %30 = arith.subf %29, %4 : vector<16x128xf32>
    %31 = arith.select %24, %28, %30 : vector<16x128xi1>, vector<16x128xf32>
    %cst_11 = arith.constant 2.000000e-01 : f32
    %32 = vector.broadcast %cst_11 : f32 to vector<16x128xf32>
    %33 = arith.subf %32, %4 : vector<16x128xf32>
    %cst_12 = arith.constant 0.000000e+00 : f32
    %34 = vector.broadcast %cst_12 : f32 to vector<16x128xf32>
    %35 = arith.select %22, %31, %34 : vector<16x128xi1>, vector<16x128xf32>
    %36 = arith.select %16, %33, %35 : vector<16x128xi1>, vector<16x128xf32>
    %37 = arith.subf %4, %6 : vector<16x128xf32>
    %38 = arith.mulf %37, %37 : vector<16x128xf32>
    %39 = vector.shape_cast %36 : vector<16x128xf32> to vector<2x8x128xf32>
    %cst_13 = arith.constant dense<0.000000e+00> : vector<8x128xf32>
    %40 = vector.multi_reduction <add>, %39, %cst_13 [0] : vector<2x8x128xf32> to vector<8x128xf32>
    %41 = arith.addf %0, %40 : vector<8x128xf32>
    %42 = vector.shape_cast %38 : vector<16x128xf32> to vector<2x8x128xf32>
    %cst_14 = arith.constant dense<0.000000e+00> : vector<8x128xf32>
    %43 = vector.multi_reduction <add>, %42, %cst_14 [0] : vector<2x8x128xf32> to vector<8x128xf32>
    %44 = arith.addf %0, %43 : vector<8x128xf32>
    %c1_i32 = arith.constant 1 : i32
    %cst_15 = arith.constant 4.8828125E-4 : f32
    %45 = vector.broadcast %cst_15 : f32 to vector<8x128xf32>
    %46 = arith.mulf %45, %44 : vector<8x128xf32>
    %47 = arith.addf %41, %46 : vector<8x128xf32>
    %c0_16 = arith.constant 0 : index
    %c0_17 = arith.constant 0 : index
    %48 = vector.load %arg3[%c0_16, %c0_17] : memref<8x128xf32, #tpu.memory_space<vmem>>, vector<8x128xf32>
    tpu.vector_store %arg3[%c0_16, %c0_17], %47 {strides = array<i32>} : memref<8x128xf32, #tpu.memory_space<vmem>>, vector<8x128xf32>,
    return
  }
  func.func @transform_0(%arg0: i32) -> (i32, i32) {
    %c0_i32 = arith.constant 0 : i32
    %c0_i32_0 = arith.constant 0 : i32
    return %arg0, %c0_i32 : i32, i32
  }
  func.func @transform_1(%arg0: i32) -> (i32, i32) {
    %c0_i32 = arith.constant 0 : i32
    %c0_i32_0 = arith.constant 0 : i32
    return %arg0, %c0_i32 : i32, i32
  }
  func.func @transform_2(%arg0: i32) -> (i32, i32) {
    %c0_i32 = arith.constant 0 : i32
    %c0_i32_0 = arith.constant 0 : i32
    return %arg0, %c0_i32 : i32, i32
  }
}

</mosaic_0001>

<bundles_post_ra>
// kernel: tpu_custom_call.1
= control target key start
LH: loop header
LB: loop body
LE: loop exit
PB: predicated region body
PF: predicated region fallthrough
CT: control target
= control target key end

     0   :  { %7 = vsyncpa [#allocation3], 0  ;;  %s257_s0 = inlined_call_operand.hbm [shape: f32[16,128], index: 0, kind: input, shape index: {}]   ;;  %s258_s1 = inlined_call_operand.hbm [shape: f32[16,128], index: 1, kind: input, shape index: {}]   ;;  %s259_s2 = inlined_call_operand.hbm [shape: f32[8,128], index: 2, kind: output, shape index: {}]  }
   0x1   :  { %8 = vsyncpa [#allocation6], 0 }
   0x2   :  { %9 = vsyncpa [#allocation4], 0  ;;  %s184_s9 = smov [#allocation2]   ;;  %s112_s13 = scalar_lea.hbm %s257_s0, 256 }
   0x3   :  { %s15_s10 = sshll.u32 %s184_s9, 4  ;;  %p113_p0 = scmp.ne.s32.totalorder %s257_s0, %s112_s13  ;;  %s16_s10 = int_to_ptr.vmem [resolvable:$true] %s15_s10 }
   0x4   :  { %p116_p1 = scmp.lt.u32.totalorder %s112_s13, %s257_s0 }
   0x6   :  { %p118_p2 = pnand %p116_p1, %p113_p0 }
   0x8   :  { %121 = shalt.err (!%p118_p2)
}
   0x9   :  { %s122_s18 = scalar_lea.vmem %s16_s10, 256  ;;  %p127_p4 = scmp.lt.s32.totalorder %s16_s10, %s16_s10 }
   0xa   :  { %p123_p3 = scmp.ne.s32.totalorder %s16_s10, %s122_s18  ;;  %p128_p5 = scmp.lt.s32.totalorder %s122_s18, %s122_s18 }
   0xc   :  { %p129_p6 = por %p128_p5, %p127_p4 }
   0xe   :  { %p130_p7 = pnand %p129_p6, %p123_p3 }
  0x10   :  { %133 = shalt.err (!%p130_p7)
}
  0x11   :  { %s185_s19 = smov 128   ;;  %s186_s20 = smov 8  }
  0x12   :  { %21 = dma.hbm_to_vmem [thread:$0]  %s257_s0, 256, %s16_s10, [#allocation3], %s185_s19, %s185_s19, %s186_s20  }
  0x13   :  { %s187_s23 = smov [#allocation5]   ;;  %s134_s27 = scalar_lea.hbm %s258_s1, 256 }
  0x14   :  { %s27_s24 = sshll.u32 %s187_s23, 4  ;;  %p135_p8 = scmp.ne.s32.totalorder %s258_s1, %s134_s27  ;;  %s28_s24 = int_to_ptr.vmem [resolvable:$true] %s27_s24 }
  0x15   :  { %p138_p9 = scmp.lt.u32.totalorder %s134_s27, %s258_s1 }
  0x17   :  { %p140_p10 = pnand %p138_p9, %p135_p8 }
  0x19   :  { %143 = shalt.err (!%p140_p10)
}
  0x1a   :  { %s144_s4 = scalar_lea.vmem %s28_s24, 256  ;;  %p149_p12 = scmp.lt.s32.totalorder %s28_s24, %s28_s24 }
  0x1b   :  { %p145_p11 = scmp.ne.s32.totalorder %s28_s24, %s144_s4  ;;  %p150_p13 = scmp.lt.s32.totalorder %s144_s4, %s144_s4 }
  0x1d   :  { %p151_p0 = por %p150_p13, %p149_p12 }
  0x1f   :  { %p152_p1 = pnand %p151_p0, %p145_p11 }
  0x21   :  { %155 = shalt.err (!%p152_p1)
}
  0x22   :  { %33 = dma.hbm_to_vmem [thread:$0]  %s258_s1, 256, %s28_s24, [#allocation6], %s185_s19, %s185_s19, %s186_s20  }
  0x23   :  { %178 = dma.done.wait [#allocation3], 256  }
  0x24   :  { %179 = vsyncadd [#allocation3], 4294967040 }
  0x25   :  { %180 = dma.done.wait [#allocation6], 256  }
  0x26   :  { %181 = vsyncadd [#allocation6], 4294967040  ;;  %v40_v0 = vld [vmem:[#allocation2] sm:$0xff]  ;;  %v42_v1 = vld [vmem:[#allocation5] sm:$0xff]  ;;  %s188_s1 = smov [#allocation7]  }
  0x27   :  { %v41_v2 = vld [vmem:[#allocation2 + $0x8] sm:$0xff]  ;;  %v43_v3 = vld [vmem:[#allocation5 + $0x8] sm:$0xff]  ;;  %vm44_vm0 = vcmp.eq.f32.partialorder %v42_v1, 1.0  ;;  %vm48_vm2 = vcmp.gt.f32.partialorder %v40_v0, -0.2  ;;  %vm64_vm7 = vcmp.lt.f32.partialorder %v40_v0, 1.0  ;;  %v80_v4 = vsub.f32 %v40_v0, %v42_v1 }
  0x28   :  { %vm45_vm3 = vcmp.eq.f32.partialorder %v43_v3, 1.0  ;;  %vm49_vm4 = vcmp.gt.f32.partialorder %v41_v2, -0.2  ;;  %vm50_vm5 = vmand %vm44_vm0, %vm48_vm2  ;;  %vm52_vm6 = vcmp.lt.f32.partialorder %v40_v0, 0.2  ;;  %vm47_vm8 = vcmp.eq.f32.partialorder %v43_v3, 0.0 }
  0x29   :  { %vm51_vm9 = vmand %vm45_vm3, %vm49_vm4  ;;  %vm53_vm10 = vcmp.lt.f32.partialorder %v41_v2, 0.2  ;;  %vm56_vm11 = vcmp.gt.f32.partialorder %v40_v0, 0.8  ;;  %vm57_vm13 = vcmp.gt.f32.partialorder %v41_v2, 0.8  ;;  %v81_v6 = vsub.f32 %v41_v2, %v43_v3 }
  0x2a   :  { %vm228_vm12 = vmand %vm50_vm5, %vm52_vm6  ;;  %vm60_vm14 = vcmp.lt.f32.partialorder %v40_v0, 1.2  ;;  %vm61_vm15 = vcmp.lt.f32.partialorder %v41_v2, 1.2  ;;  %v66_v8 = vmul.f32 0.2, %v40_v0  ;;  %v82_v11 = vmul.f32 %v80_v4, %v80_v4 }
  0x2b   :  { %vm232_vm1 = vmand %vm51_vm9, %vm53_vm10  ;;  %v67_v9 = vmul.f32 0.2, %v41_v2  ;;  %v70_v10 = vsub.f32 1.2, %v40_v0  ;;  %vm264_vm0 = vcmp.eq.f32.partialorder %v42_v1, 0.0  ;;  %vm65_vm3 = vcmp.lt.f32.partialorder %v41_v2, 1.0 }
  0x2c   :  { %vm58_vm2 = vmand %vm264_vm0, %vm56_vm11  ;;  %v71_v12 = vsub.f32 1.2, %v41_v2  ;;  %v74_v13 = vsub.f32 0.2, %v40_v0  ;;  %v83_v14 = vmul.f32 %v81_v6, %v81_v6  ;;  %v68_v15 = vadd.f32 0.8, %v66_v8 }
  0x2d   :  { %vm59_vm4 = vmand %vm47_vm8, %vm57_vm13  ;;  %v69_v16 = vadd.f32 0.8, %v67_v9  ;;  %v75_v17 = vsub.f32 0.2, %v41_v2  ;;  %s97_s6 = sshll.u32 %s188_s1, 4  ;;  %s98_s6 = int_to_ptr.vmem [resolvable:$true] %s97_s6 }
  0x2e   :  { %vm62_vm5 = vmand %vm58_vm2, %vm60_vm14  ;;  %v86_v18 = vadd.f32 %v83_v14, %v82_v11  ;;  %v72_v19 = vsel %vm64_vm7, %v68_v15, %v70_v10  ;;  %s156_s7 = scalar_lea.vmem %s98_s6, 128  ;;  %p161_p3 = scmp.lt.s32.totalorder %s98_s6, %s98_s6 }
  0x2f   :  { %vm63_vm6 = vmand %vm59_vm4, %vm61_vm15  ;;  %v73_v20 = vsel %vm65_vm3, %v69_v16, %v71_v12  ;;  %v76_v21 = vsel %vm62_vm5, %v72_v19, 0.0  ;;  %p157_p2 = scmp.ne.s32.totalorder %s98_s6, %s156_s7  ;;  %p162_p4 = scmp.lt.s32.totalorder %s156_s7, %s156_s7 }
  0x30   :  { %v77_v22 = vsel %vm63_vm6, %v73_v20, 0.0  ;;  %v88_v23 = vmul.f32 0.00048828125, %v86_v18  ;;  %v78_v24 = vsel %vm228_vm12, %v74_v13, %v76_v21 }
  0x31   :  { %v79_v25 = vsel %vm232_vm1, %v75_v17, %v77_v22  ;;  %p163_p5 = por %p162_p4, %p161_p3 }
  0x32   :  { %v84_v26 = vadd.f32 %v79_v25, %v78_v24 }
  0x33   :  { %p164_p6 = pnand %p163_p5, %p157_p2 }
  0x34   :  { %v89_v27 = vadd.f32 %v88_v23, %v84_v26 }
  0x36   :  { %90 = vst [vmem:[#allocation7] sm:$0xff] %v89_v27 }
  0x37   :  { %167 = shalt.err (!%p164_p6)
}
  0x38   :  { %s168_s10 = scalar_lea.hbm %s259_s2, 128 }
  0x39   :  { %p169_p7 = scmp.ne.s32.totalorder %s259_s2, %s168_s10  ;;  %p172_p8 = scmp.lt.u32.totalorder %s168_s10, %s259_s2 }
  0x3b   :  { %p174_p9 = pnand %p172_p8, %p169_p7 }
  0x3d   :  { %177 = shalt.err (!%p174_p9)
}
  0x3e   :  { %100 = dma.vmem_to_hbm [thread:$0]  %s98_s6, 128, %s259_s2, [#allocation4]  }
  0x3f   :  { %182 = dma.done.wait [#allocation4], 128  }
  0x40   :  { %183 = vsyncadd [#allocation4], 4294967168 }
  0x41   :  { %104 = vsyncpa [#allocation3], 1 }
  0x42   :  { %105 = vsyncpa [#allocation6], 1 }
  0x43   :  { %106 = vsyncpa [#allocation4], 1 }

</bundles_post_ra>
